<compile_context>
chip_gen: v7x
topology: tpu7x:2x2x1
jax: 0.10.0
libtpu: 0.0.40
codegen_flags: <defaults>
</compile_context>

<pallas_src>
import functools
import math

import jax
import jax.numpy as jnp
from jax import lax
from jax.experimental import pallas as pl
from jax.experimental.pallas import tpu as pltpu

LN_EPS = 1e-5  # nn.LayerNorm default


def _round_up(x, m):
    return ((x + m - 1) // m) * m


def _patch_embed_kernel(p_ref, w_ref, b_ref, g_ref, beta_ref, o_ref, *, c_real):
    # p_ref:    (TR, K)   im2col patch rows for this block (gemm dtype)
    # w_ref:    (K, Cp)   conv weight, flattened (kh, kw, ci) x Cout, 0-padded
    # b_ref:    (1, Cp)   conv bias        (f32, zero past c_real)
    # g_ref:    (1, Cp)   LayerNorm gamma  (f32, zero past c_real)
    # beta_ref: (1, Cp)   LayerNorm beta   (f32, zero past c_real)
    # o_ref:    (TR, Cp)
    acc = jnp.dot(p_ref[...], w_ref[...], preferred_element_type=jnp.float32)
    acc = acc + b_ref[...]

    # LayerNorm over the *real* embed_dim; channels >= c_real are zero-padded
    # (zero weights + zero bias), so full-width sums equal real-channel sums.
    inv_c = 1.0 / c_real
    mean = jnp.sum(acc, axis=-1, keepdims=True) * inv_c
    # Centered two-pass variance (no cancellation).  Mask padded channels,
    # since (0 - mean) would otherwise pollute the centered sum.
    col = lax.broadcasted_iota(jnp.int32, acc.shape, 1)
    centered = jnp.where(col < c_real, acc - mean, 0.0)
    var = jnp.sum(centered * centered, axis=-1, keepdims=True) * inv_c
    inv = lax.rsqrt(var + LN_EPS)

    # Padded channels: gamma = beta = 0  ->  exactly 0; wrapper slices them off.
    y = centered * (inv * g_ref[...]) + beta_ref[...]
    o_ref[...] = y.astype(o_ref.dtype)


def overlap_patch_embed(x_nchw, params, *, patch_size=7, stride=4,
                        block_rows=1024, gemm_dtype=jnp.bfloat16,
                        interpret=False):
    """Forward of OverlapPatchEmbed. Input NCHW, returns (tokens, H, W)."""
    N, Cin, Hi, Wi = x_nchw.shape
    P = patch_size
    pad = P // 2
    Ho = (Hi + 2 * pad - P) // stride + 1
    Wo = (Wi + 2 * pad - P) // stride + 1
    Cout = params["w"].shape[-1]
    out_dtype = x_nchw.dtype

    # NCHW -> NHWC, halo-pad once; cast to the GEMM dtype here so the im2col
    # array lives in HBM at half width (f32 accumulation happens in-kernel).
    x = jnp.transpose(x_nchw, (0, 2, 3, 1)).astype(gemm_dtype)
    x = jnp.pad(x, ((0, 0), (pad, pad), (pad, pad), (0, 0)))

    # im2col (layout plumbing): (N*Ho*Wo, P*P*Cin), tap order (kh, kw, ci).
    taps = []
    for kh in range(P):
        for kw in range(P):
            taps.append(lax.slice(
                x,
                (0, kh, kw, 0),
                (N, kh + (Ho - 1) * stride + 1, kw + (Wo - 1) * stride + 1, Cin),
                (1, stride, stride, 1)))
    patches = jnp.stack(taps, axis=3)                    # (N, Ho, Wo, P*P, Cin)
    K = P * P * Cin
    rows = N * Ho * Wo
    patches = patches.reshape(rows, K)

    # Lane-dense channel padding (no-op when embed_dim % 128 == 0, e.g. 768).
    Cp = max(128, _round_up(Cout, 128))
    dC = Cp - Cout
    w2 = jnp.pad(params["w"].reshape(K, Cout), ((0, 0), (0, dC))).astype(gemm_dtype)
    b2 = jnp.pad(params["b"].reshape(1, Cout).astype(jnp.float32), ((0, 0), (0, dC)))
    g2 = jnp.pad(params["gamma"].reshape(1, Cout).astype(jnp.float32), ((0, 0), (0, dC)))
    beta2 = jnp.pad(params["beta"].reshape(1, Cout).astype(jnp.float32), ((0, 0), (0, dC)))

    # ---- row-tile selection + derived VMEM limit ---------------------------
    gemm_bytes = jnp.dtype(gemm_dtype).itemsize
    out_bytes = jnp.dtype(out_dtype).itemsize
    lane_k = _round_up(K, 128)

    def tile_bytes(tr_):
        # Double-buffered patches & output tiles + (conservatively assumed
        # double-buffered) resident weight + the tiny LN parameter rows.
        return (2 * tr_ * lane_k * gemm_bytes
                + 2 * tr_ * Cp * out_bytes
                + 2 * _round_up(K, 16) * Cp * gemm_bytes
                + 2 * 3 * 8 * Cp * 4)

    tr = min(block_rows, _round_up(rows, 8))
    min_steps = 8                       # keep both v7x TensorCores fed
    if rows >= min_steps * 256:
        tr = min(tr, _round_up(-(-rows // min_steps), 8))
    vmem_budget = 40 * 1024 * 1024      # fits v5e/v6e/v7x physical VMEM
    while tr > 8 and tile_bytes(tr) > vmem_budget:
        tr = max(8, _round_up(tr // 2, 8))
    vmem_limit = int(min(tile_bytes(tr) + (8 << 20), 56 * 1024 * 1024))

    rows_pad = _round_up(rows, tr)
    if rows_pad != rows:
        patches = jnp.pad(patches, ((0, rows_pad - rows), (0, 0)))

    kernel = functools.partial(_patch_embed_kernel, c_real=Cout)
    out = pl.pallas_call(
        kernel,
        out_shape=jax.ShapeDtypeStruct((rows_pad, Cp), out_dtype),
        grid_spec=pltpu.PrefetchScalarGridSpec(
            num_scalar_prefetch=0,
            grid=(rows_pad // tr,),
            in_specs=[
                pl.BlockSpec((tr, K), lambda i: (i, 0)),    # patch rows (tiled)
                pl.BlockSpec((K, Cp), lambda i: (0, 0)),    # weight (resident)
                pl.BlockSpec((1, Cp), lambda i: (0, 0)),    # bias
                pl.BlockSpec((1, Cp), lambda i: (0, 0)),    # LN gamma
                pl.BlockSpec((1, Cp), lambda i: (0, 0)),    # LN beta
            ],
            out_specs=pl.BlockSpec((tr, Cp), lambda i: (i, 0)),
        ),
        compiler_params=pltpu.CompilerParams(
            dimension_semantics=("parallel",),
            vmem_limit_bytes=vmem_limit,
        ),
        interpret=interpret,
    )(patches, w2, b2, g2, beta2)

    # Only slice when actually needed (pure reshape otherwise).
    if rows_pad != rows:
        out = out[:rows]
    if dC:
        # TODO(synk): keep the Cp-padded channel layout downstream to avoid
        # this non-lane-dense copy when embed_dim % 128 != 0.
        out = out[:, :Cout]
    tokens = out.reshape(N, Ho * Wo, Cout)
    return tokens, Ho, Wo


# ---------------- pure-JAX reference (for correctness check) ----------------
def overlap_patch_embed_ref(x_nchw, params, *, patch_size=7, stride=4):
    P = patch_size
    pad = P // 2
    x = jnp.transpose(x_nchw, (0, 2, 3, 1))
    y = lax.conv_general_dilated(
        x, params["w"], window_strides=(stride, stride),
        padding=((pad, pad), (pad, pad)),
        dimension_numbers=("NHWC", "HWIO", "NHWC")) + params["b"]
    N, Ho, Wo, C = y.shape
    y = y.reshape(N, Ho * Wo, C)
    mean = jnp.mean(y, axis=-1, keepdims=True)
    var = jnp.mean((y - mean) ** 2, axis=-1, keepdims=True)
    y = (y - mean) * lax.rsqrt(var + LN_EPS) * params["gamma"] + params["beta"]
    return y, Ho, Wo


if __name__ == "__main__":
    key = jax.random.PRNGKey(0)
    kx, kw, kb, kg, kbt = jax.random.split(key, 5)

    N, Cin, Hi, Wi = 2, 3, 16, 16
    P, stride, embed_dim = 7, 4, 32

    x = jax.random.normal(kx, (N, Cin, Hi, Wi), jnp.float32)  # NCHW
    fan_out = P * P * embed_dim
    params = {
        # conv weight stored HWIO (kh, kw, ci, co); PyTorch OIHW transposed
        "w": jax.random.normal(kw, (P, P, Cin, embed_dim), jnp.float32)
             * math.sqrt(2.0 / fan_out),
        "b": jax.random.normal(kb, (embed_dim,), jnp.float32) * 0.01,
        "gamma": 1.0 + 0.1 * jax.random.normal(kg, (embed_dim,), jnp.float32),
        "beta": 0.1 * jax.random.normal(kbt, (embed_dim,), jnp.float32),
    }

    # f32 reference and a bf16-quantized-input reference (same quantization the
    # default kernel applies to its GEMM operands; accumulation stays f32).
    ref, Ho_r, Wo_r = overlap_patch_embed_ref(x, params, patch_size=P, stride=stride)
    ref = jax.block_until_ready(ref)
    x16 = x.astype(jnp.bfloat16).astype(jnp.float32)
    params16 = dict(params, w=params["w"].astype(jnp.bfloat16).astype(jnp.float32))
    ref16, _, _ = overlap_patch_embed_ref(x16, params16, patch_size=P, stride=stride)
    ref16 = jax.block_until_ready(ref16)

    # Default kernel: bf16 GEMM operands, f32 accumulate + LayerNorm.
    fwd = jax.jit(functools.partial(overlap_patch_embed, patch_size=P, stride=stride))
    tokens, Ho, Wo = fwd(x, params)
    tokens = jax.block_until_ready(tokens)
    Ho, Wo = int(Ho), int(Wo)

    # f32-GEMM variant: tight structural check against the exact reference.
    fwd32 = jax.jit(functools.partial(overlap_patch_embed, patch_size=P,
                                      stride=stride, gemm_dtype=jnp.float32))
    tokens32, _, _ = fwd32(x, params)
    tokens32 = jax.block_until_ready(tokens32)

    assert (Ho, Wo) == (Ho_r, Wo_r) == (Hi // stride, Wi // stride), (Ho, Wo)
    assert tokens.shape == (N, Ho * Wo, embed_dim), tokens.shape

    err32 = float(jnp.max(jnp.abs(tokens32 - ref)))
    assert jnp.allclose(tokens32, ref, atol=1e-4, rtol=1e-4), err32
    err16 = float(jnp.max(jnp.abs(tokens - ref16)))
    assert jnp.allclose(tokens, ref16, atol=5e-3, rtol=5e-3), err16

    print("KERNEL_OK")
</pallas_src>

<mosaic_0001>
module attributes {stable_mosaic.version = 11 : i64} {
  func.func @_patch_embed_kernel(%arg0: i32, %arg1: memref<32x147xbf16, #tpu.memory_space<vmem>>, %arg2: memref<147x128xbf16, #tpu.memory_space<vmem>>, %arg3: memref<1x128xf32, #tpu.memory_space<vmem>>, %arg4: memref<1x128xf32, #tpu.memory_space<vmem>>, %arg5: memref<1x128xf32, #tpu.memory_space<vmem>>, %arg6: memref<32x128xf32, #tpu.memory_space<vmem>>) attributes {dimension_semantics = [#tpu.dimension_semantics<parallel>], iteration_bounds = array<i64: 1>, scalar_prefetch = 0 : i64, scratch_operands = 0 : i64, tpu.core_type = #tpu.core_type<tc>, window_params = [{transform_indices = @transform_0, window_bounds = array<i64: 32, 147>}, {pipeline_mode = #tpu.pipeline_mode<synchronous>, transform_indices = @transform_1, window_bounds = array<i64: 147, 128>}, {pipeline_mode = #tpu.pipeline_mode<synchronous>, transform_indices = @transform_2, window_bounds = array<i64: 1, 128>}, {pipeline_mode = #tpu.pipeline_mode<synchronous>, transform_indices = @transform_3, window_bounds = array<i64: 1, 128>}, {pipeline_mode = #tpu.pipeline_mode<synchronous>, transform_indices = @transform_4, window_bounds = array<i64: 1, 128>}, {transform_indices = @transform_5, window_bounds = array<i64: 32, 128>}]} {
    %c0 = arith.constant 0 : index
    %c0_0 = arith.constant 0 : index
    %0 = vector.load %arg1[%c0, %c0_0] : memref<32x147xbf16, #tpu.memory_space<vmem>>, vector<32x147xbf16>
    %c0_1 = arith.constant 0 : index
    %c0_2 = arith.constant 0 : index
    %1 = vector.load %arg2[%c0_1, %c0_2] : memref<147x128xbf16, #tpu.memory_space<vmem>>, vector<147x128xbf16>
    %cst = arith.constant dense<0.000000e+00> : vector<32x128xf32>
    %2 = tpu.matmul %0, %1, %cst {dimension_numbers = #tpu.dot_dimension_numbers<[1], [0], [0], [1], [0, 0, 1, 1], [], []>} : vector<32x147xbf16>, vector<147x128xbf16>, vector<32x128xf32> -> vector<32x128xf32>
    %c0_3 = arith.constant 0 : index
    %c0_4 = arith.constant 0 : index
    %3 = vector.load %arg3[%c0_3, %c0_4] : memref<1x128xf32, #tpu.memory_space<vmem>>, vector<1x128xf32>
    %4 = vector.broadcast %3 : vector<1x128xf32> to vector<32x128xf32>
    %5 = arith.addf %2, %4 : vector<32x128xf32>
    %cst_5 = arith.constant dense<0.000000e+00> : vector<32xf32>
    %6 = vector.multi_reduction <add>, %5, %cst_5 [1] : vector<32x128xf32> to vector<32xf32>
    %7 = vector.shape_cast %6 : vector<32xf32> to vector<32x1xf32>
    %cst_6 = arith.constant 3.125000e-02 : f32
    %8 = vector.broadcast %cst_6 : f32 to vector<32x1xf32>
    %9 = arith.mulf %7, %8 : vector<32x1xf32>
    %10 = tpu.iota {dimensions = array<i32: 1>} : vector<32x128xi32>
    %c32_i32 = arith.constant 32 : i32
    %11 = vector.broadcast %c32_i32 : i32 to vector<32x128xi32>
    %12 = arith.cmpi slt, %10, %11 : vector<32x128xi32>
    %13 = vector.broadcast %9 : vector<32x1xf32> to vector<32x128xf32>
    %14 = arith.subf %5, %13 : vector<32x128xf32>
    %cst_7 = arith.constant 0.000000e+00 : f32
    %15 = vector.broadcast %cst_7 : f32 to vector<32x128xf32>
    %16 = arith.select %12, %14, %15 : vector<32x128xi1>, vector<32x128xf32>
    %17 = arith.mulf %16, %16 : vector<32x128xf32>
    %cst_8 = arith.constant dense<0.000000e+00> : vector<32xf32>
    %18 = vector.multi_reduction <add>, %17, %cst_8 [1] : vector<32x128xf32> to vector<32xf32>
    %19 = vector.shape_cast %18 : vector<32xf32> to vector<32x1xf32>
    %cst_9 = arith.constant 3.125000e-02 : f32
    %20 = vector.broadcast %cst_9 : f32 to vector<32x1xf32>
    %21 = arith.mulf %19, %20 : vector<32x1xf32>
    %cst_10 = arith.constant 9.99999974E-6 : f32
    %22 = vector.broadcast %cst_10 : f32 to vector<32x1xf32>
    %23 = arith.addf %21, %22 : vector<32x1xf32>
    %24 = math.rsqrt %23 : vector<32x1xf32>
    %c0_11 = arith.constant 0 : index
    %c0_12 = arith.constant 0 : index
    %25 = vector.load %arg4[%c0_11, %c0_12] : memref<1x128xf32, #tpu.memory_space<vmem>>, vector<1x128xf32>
    %26 = vector.broadcast %24 : vector<32x1xf32> to vector<32x128xf32>
    %27 = vector.broadcast %25 : vector<1x128xf32> to vector<32x128xf32>
    %28 = arith.mulf %26, %27 : vector<32x128xf32>
    %29 = arith.mulf %16, %28 : vector<32x128xf32>
    %c0_13 = arith.constant 0 : index
    %c0_14 = arith.constant 0 : index
    %30 = vector.load %arg5[%c0_13, %c0_14] : memref<1x128xf32, #tpu.memory_space<vmem>>, vector<1x128xf32>
    %31 = vector.broadcast %30 : vector<1x128xf32> to vector<32x128xf32>
    %32 = arith.addf %29, %31 : vector<32x128xf32>
    %c0_15 = arith.constant 0 : index
    %c0_16 = arith.constant 0 : index
    %33 = vector.load %arg6[%c0_15, %c0_16] : memref<32x128xf32, #tpu.memory_space<vmem>>, vector<32x128xf32>
    tpu.vector_store %arg6[%c0_15, %c0_16], %32 {strides = array<i32>} : memref<32x128xf32, #tpu.memory_space<vmem>>, vector<32x128xf32>,
    return
  }
  func.func @transform_0(%arg0: i32) -> (i32, i32) {
    %c0_i32 = arith.constant 0 : i32
    %c0_i32_0 = arith.constant 0 : i32
    return %arg0, %c0_i32 : i32, i32
  }
  func.func @transform_1(%arg0: i32) -> (i32, i32) {
    %c0_i32 = arith.constant 0 : i32
    %c0_i32_0 = arith.constant 0 : i32
    %c0_i32_1 = arith.constant 0 : i32
    return %c0_i32, %c0_i32_0 : i32, i32
  }
  func.func @transform_2(%arg0: i32) -> (i32, i32) {
    %c0_i32 = arith.constant 0 : i32
    %c0_i32_0 = arith.constant 0 : i32
    %c0_i32_1 = arith.constant 0 : i32
    return %c0_i32, %c0_i32_0 : i32, i32
  }
  func.func @transform_3(%arg0: i32) -> (i32, i32) {
    %c0_i32 = arith.constant 0 : i32
    %c0_i32_0 = arith.constant 0 : i32
    %c0_i32_1 = arith.constant 0 : i32
    return %c0_i32, %c0_i32_0 : i32, i32
  }
  func.func @transform_4(%arg0: i32) -> (i32, i32) {
    %c0_i32 = arith.constant 0 : i32
    %c0_i32_0 = arith.constant 0 : i32
    %c0_i32_1 = arith.constant 0 : i32
    return %c0_i32, %c0_i32_0 : i32, i32
  }
  func.func @transform_5(%arg0: i32) -> (i32, i32) {
    %c0_i32 = arith.constant 0 : i32
    %c0_i32_0 = arith.constant 0 : i32
    return %arg0, %c0_i32 : i32, i32
  }
}

</mosaic_0001>

<bundles_post_ra>
// kernel: overlap_patch_embed.1
= control target key start
LH: loop header
LB: loop body
LE: loop exit
PB: predicated region body
PF: predicated region fallthrough
CT: control target
= control target key end

     0   :  { %v375_v1 = vmov 0   ;;  %vm127_vm0 = vcmask 154624   ;;  %s477_s0 = inlined_call_operand.vmem [shape: bf16[32,147], index: 0, kind: input, shape index: {}]   ;;  %s478_s1 = inlined_call_operand.vmem [shape: bf16[147,128], index: 1, kind: input, shape index: {}]   ;;  %s479_s2 = inlined_call_operand.vmem [shape: f32[1,128], index: 2, kind: input, shape index: {}]   ;;  %s480_s3 = inlined_call_operand.vmem [shape: f32[1,128], index: 3, kind: input, shape index: {}]   ;;  %s481_s4 = inlined_call_operand.vmem [shape: f32[1,128], index: 4, kind: input, shape index: {}]   ;;  %s482_s5 = inlined_call_operand.hbm [shape: f32[32,128], index: 5, kind: output, shape index: {}]  }
   0x1   :  { %v327_v0 = vld [vmem:[%s478_s1] sm:$0xff]   ;;  %141 = vmatprep.subr.bf16.mxu0 %v375_v1  ;;  %302 = vmatprep.subr.bf16.mxu1 %v375_v1  ;;  %v328_v2 = vld [vmem:[%s478_s1 + $0x8] sm:$0xff]   ;;  %v329_v3 = vld [vmem:[%s478_s1 + $0x10] sm:$0xff]  }
   0x2   :  { %142 = vmatpush1.bf16.msra.mxu0 %v327_v0  ;;  %312 = vmatpush1.bf16.msra.mxu1 %v327_v0  ;;  %v330_v4 = vld [vmem:[%s478_s1 + $0x18] sm:$0xff]   ;;  %v339_v5 = vld [vmem:[%s477_s0 + $0x4] ss:$8 sps:$4 sm:$0xff]  }
   0x3   :  { %143 = vmatprep.subr.bf16.mxu0 %v375_v1  ;;  %303 = vmatprep.subr.bf16.mxu1 %v375_v1  ;;  %v342_v6 = vld [vmem:[%s477_s0 + $0x14] ss:$8 sps:$4 sm:$0xff]  }
   0x4   :  { %298 = vmatprep.mubr.msk.bf16.mxu0 %vm127_vm0, %v339_v5 }
   0x6   :  { %144 = vmatpush1.bf16.msra.mxu0 %v328_v2  ;;  %313 = vmatpush1.bf16.msra.mxu1 %v328_v2 }
   0x7   :  { %145 = vmatprep.subr.bf16.mxu0 %v375_v1  ;;  %304 = vmatprep.subr.bf16.mxu1 %v375_v1 }
   0xa   :  { %146 = vmatpush1.bf16.msra.mxu0 %v329_v3  ;;  %314 = vmatpush1.bf16.msra.mxu1 %v329_v3 }
   0xb   :  { %147 = vmatprep.subr.bf16.mxu0 %v375_v1  ;;  %305 = vmatprep.subr.bf16.mxu1 %v375_v1 }
   0xc   :  { %10 = vsyncpa [#allocation3], 0  ;;  %v331_v7 = vld [vmem:[%s478_s1 + $0x20] sm:$0xff]   ;;  %299 = vmatprep.mubr.msk.bf16.mxu1 %vm127_vm0, %v342_v6  ;;  %v332_v8 = vld [vmem:[%s478_s1 + $0x28] sm:$0xff]   ;;  %vm134_vm1 = vcmask 1040384   ;;  %vm135_vm2 = vcmask 1041408   ;;  %v202_v32 = vlaneseq }
   0xd   :  { %v333_v9 = vld [vmem:[%s478_s1 + $0x30] sm:$0xff]   ;;  %v334_v10 = vld [vmem:[%s478_s1 + $0x38] sm:$0xff]   ;;  %v376_v11 = vmov 65535   ;;  %v335_v13 = vld [vmem:[%s478_s1 + $0x40] sm:$0xff]  }
   0xe   :  { %148 = vmatpush1.bf16.msra.mxu0 %v330_v4  ;;  %315 = vmatpush1.bf16.msra.mxu1 %v330_v4  ;;  %v136_v12 = vsel %vm134_vm1, 4294967295, %v376_v11  ;;  %v336_v14 = vld [vmem:[%s478_s1 + $0x48] ss:$0 sps:$4 sm:$0x33]   ;;  %v340_v18 = vld [vmem:[%s477_s0 + $0x10] ss:$8 sps:$4 sm:$0xff]  }
   0xf   :  { %149 = vmatprep.subr.bf16.mxu0 %v375_v1  ;;  %306 = vmatprep.subr.bf16.mxu1 %v375_v1  ;;  %v137_v15 = vsel %vm135_vm2, %v136_v12, 0  ;;  %v337_v17 = vld [vmem:[%s477_s0] ss:$8 sps:$4 sm:$0xff]   ;;  %v203_v33 = vand.u32 127, %v202_v32 }
  0x10   :  { %v139_v16 = vand.u32 %v336_v14, %v137_v15  ;;  %v283_v19 = vld [vmem:[%s479_s2] ss:$0 sm:$0xff] }
  0x11   :  { %vm204_vm3 = vcmp.lt.s32.totalorder %v203_v33, 32  ;;  %v300_v2 = vld [vmem:[%s480_s3] ss:$0 sm:$0xff]  ;;  %s377_s3 = smov [#allocation2]  }
  0x12   :  { %150 = vmatpush1.bf16.msra.mxu0 %v331_v7  ;;  %316 = vmatpush1.bf16.msra.mxu1 %v331_v7  ;;  %v301_v5 = vld [vmem:[%s481_s4] ss:$0 sm:$0xff]  ;;  %s272_s24 = sshll.u32 %s377_s3, 4  ;;  %s273_s24 = int_to_ptr.vmem [resolvable:$true] %s272_s24 }
  0x13   :  { %151 = vmatprep.subr.bf16.mxu0 %v375_v1  ;;  %307 = vmatprep.subr.bf16.mxu1 %v375_v1  ;;  %s351_s4 = scalar_lea.vmem %s273_s24, 512  ;;  %p356_p1 = scmp.lt.s32.totalorder %s273_s24, %s273_s24 }
  0x14   :  { %p352_p0 = scmp.ne.s32.totalorder %s273_s24, %s351_s4  ;;  %p357_p2 = scmp.lt.s32.totalorder %s351_s4, %s351_s4 }
  0x16   :  { %152 = vmatpush1.bf16.msra.mxu0 %v332_v8  ;;  %317 = vmatpush1.bf16.msra.mxu1 %v332_v8  ;;  %p358_p3 = por %p357_p2, %p356_p1 }
  0x17   :  { %153 = vmatprep.subr.bf16.mxu0 %v375_v1  ;;  %308 = vmatprep.subr.bf16.mxu1 %v375_v1 }
  0x18   :  { %p359_p4 = pnand %p358_p3, %p352_p0 }
  0x1a   :  { %154 = vmatpush1.bf16.msra.mxu0 %v333_v9  ;;  %318 = vmatpush1.bf16.msra.mxu1 %v333_v9 }
  0x1b   :  { %155 = vmatprep.subr.bf16.mxu0 %v375_v1  ;;  %309 = vmatprep.subr.bf16.mxu1 %v375_v1 }
  0x1e   :  { %156 = vmatpush1.bf16.msra.mxu0 %v334_v10  ;;  %319 = vmatpush1.bf16.msra.mxu1 %v334_v10 }
  0x1f   :  { %157 = vmatprep.subr.bf16.mxu0 %v375_v1  ;;  %310 = vmatprep.subr.bf16.mxu1 %v375_v1 }
  0x22   :  { %158 = vmatpush1.bf16.msra.mxu0 %v335_v13  ;;  %320 = vmatpush1.bf16.msra.mxu1 %v335_v13 }
  0x23   :  { %159 = vmatprep.subr.bf16.mxu0 %v375_v1  ;;  %311 = vmatprep.subr.bf16.mxu1 %v375_v1 }
  0x26   :  { %160 = vmatpush1.bf16.msra.mxu0 %v139_v16  ;;  %321 = vmatpush1.bf16.msra.mxu1 %v139_v16 }
  0x29   :  { %174 = vmatmul.mubr.bf16.vlgmr.msra.gmra.mrb[0].mxu0 %v337_v17  ;;  %182 = vmatmul.mubr.bf16.vlgmr.msra.gmra.mrb[0].mxu1 %v340_v18 }
  0xfc   :  { %v175_v20 = vpop.f32.mrb[0].mxu0  ;;  %v183_v21 = vpop.f32.mrb[0].mxu1 }
  0xfd   :  { %v176_v22 = vadd.f32 %v283_v19, %v175_v20  ;;  %v184_v23 = vadd.f32 %v283_v19, %v183_v21  ;;  %v177_v24 = vpop.f32.mrb[1].mxu0  ;;  %v185_v25 = vpop.f32.mrb[1].mxu1 }
  0xfe   :  { %v178_v26 = vpop.f32.mrb[2].mxu0  ;;  %v186_v27 = vpop.f32.mrb[2].mxu1 }
  0xff   :  { %v187_v28 = vadd.f32 %v283_v19, %v186_v27  ;;  %194 = vadd.xlane.f32.xlu1 %v184_v23  ;;  %v180_v29 = vpop.f32.mrb[3].mxu0  ;;  %190 = vadd.xlane.f32.xlu0 %v176_v22  ;;  %v188_v30 = vpop.f32.mrb[3].mxu1  ;;  %v179_v31 = vadd.f32 %v283_v19, %v178_v26 }
 0x103   :  { %196 = vadd.xlane.f32.xlu1 %v187_v28  ;;  %192 = vadd.xlane.f32.xlu0 %v179_v31 }
 0x18c   :  { %v195_v34 = vpop.xlane.xlu1 %194  ;;  %v191_v35 = vpop.xlane.xlu0 %190 }
 0x18d   :  { %v200_v36 = vmul.f32 0.03125, %v195_v34  ;;  %v198_v37 = vmul.f32 0.03125, %v191_v35 }
 0x18f   :  { %v207_v38 = vsub.f32 %v184_v23, %v200_v36  ;;  %v205_v39 = vsub.f32 %v176_v22, %v198_v37 }
 0x190   :  { %v197_v40 = vpop.xlane.xlu1 %196  ;;  %v193_v41 = vpop.xlane.xlu0 %192 }
 0x191   :  { %v201_v42 = vmul.f32 0.03125, %v197_v40  ;;  %v199_v43 = vmul.f32 0.03125, %v193_v41  ;;  %v209_v44 = vsel %vm204_vm3, %v205_v39, 0.0  ;;  %v211_v48 = vsel %vm204_vm3, %v207_v38, 0.0 }
 0x192   :  { %v213_v45 = vmul.f32 %v209_v44, %v209_v44  ;;  %v215_v50 = vmul.f32 %v211_v48, %v211_v48 }
 0x193   :  { %v208_v46 = vsub.f32 %v187_v28, %v201_v42  ;;  %v206_v47 = vsub.f32 %v179_v31, %v199_v43 }
 0x194   :  { %217 = vadd.xlane.f32.xlu0 %v213_v45 }
 0x195   :  { %v210_v49 = vsel %vm204_vm3, %v206_v47, 0.0  ;;  %v212_v52 = vsel %vm204_vm3, %v208_v46, 0.0 }
 0x196   :  { %v214_v51 = vmul.f32 %v210_v49, %v210_v49  ;;  %v216_v53 = vmul.f32 %v212_v52, %v212_v52 }
 0x198   :  { %221 = vadd.xlane.f32.xlu0 %v215_v50  ;;  %219 = vadd.xlane.f32.xlu1 %v214_v51 }
 0x19c   :  { %223 = vadd.xlane.f32.xlu1 %v216_v53 }
 0x221   :  { %v218_v54 = vpop.xlane.xlu0 %217 }
 0x222   :  { %v225_v55 = vmul.f32 0.03125, %v218_v54 }
 0x224   :  { %v229_v56 = vadd.f32 1e-05, %v225_v55 }
 0x225   :  { %v220_v57 = vpop.xlane.xlu1 %219  ;;  %v222_v58 = vpop.xlane.xlu0 %221 }
 0x226   :  { %343 = vrsqrt.f32 %v229_v56  ;;  %v226_v59 = vmul.f32 0.03125, %v220_v57  ;;  %v227_v60 = vmul.f32 0.03125, %v222_v58 }
 0x228   :  { %v230_v61 = vadd.f32 1e-05, %v226_v59  ;;  %v231_v62 = vadd.f32 1e-05, %v227_v60 }
 0x229   :  { %v224_v63 = vpop.xlane.xlu1 %223 }
 0x22a   :  { %345 = vrsqrt.f32 %v230_v61  ;;  %v228_v0 = vmul.f32 0.03125, %v224_v63 }
 0x22b   :  { %347 = vrsqrt.f32 %v231_v62 }
 0x22c   :  { %v232_v1 = vadd.f32 1e-05, %v228_v0 }
 0x22e   :  { %349 = vrsqrt.f32 %v232_v1 }
 0x230   :  { %v344_v3 = vpop.eup %343 }
 0x231   :  { %v244_v4 = vmul.f32 %v344_v3, %v300_v2 }
 0x233   :  { %v248_v6 = vmul.f32 %v244_v4, %v209_v44 }
 0x234   :  { %v346_v7 = vpop.eup %345 }
 0x235   :  { %v348_v8 = vpop.eup %347  ;;  %v245_v9 = vmul.f32 %v346_v7, %v300_v2  ;;  %v259_v10 = vadd.f32 %v301_v5, %v248_v6 }
 0x236   :  { %v246_v11 = vmul.f32 %v348_v8, %v300_v2 }
 0x237   :  { %v249_v12 = vmul.f32 %v245_v9, %v210_v49  ;;  %263 = vst [vmem:[#allocation2] sm:$0xff] %v259_v10 }
 0x238   :  { %v350_v13 = vpop.eup %349  ;;  %v250_v14 = vmul.f32 %v246_v11, %v211_v48 }
 0x239   :  { %v247_v15 = vmul.f32 %v350_v13, %v300_v2  ;;  %v260_v16 = vadd.f32 %v301_v5, %v249_v12 }
 0x23a   :  { %v261_v17 = vadd.f32 %v301_v5, %v250_v14 }
 0x23b   :  { %v251_v18 = vmul.f32 %v247_v15, %v212_v52  ;;  %264 = vst [vmem:[#allocation2 + $0x8] sm:$0xff] %v260_v16 }
 0x23c   :  { %265 = vst [vmem:[#allocation2 + $0x10] sm:$0xff] %v261_v17 }
 0x23d   :  { %v262_v19 = vadd.f32 %v301_v5, %v251_v18 }
 0x23f   :  { %266 = vst [vmem:[#allocation2 + $0x18] sm:$0xff] %v262_v19 }
 0x240   :  { %362 = shalt.err (!%p359_p4)
}
 0x241   :  { %s363_s27 = scalar_lea.hbm %s482_s5, 512 }
 0x242   :  { %p364_p5 = scmp.ne.s32.totalorder %s482_s5, %s363_s27  ;;  %p367_p6 = scmp.lt.u32.totalorder %s363_s27, %s482_s5 }
 0x244   :  { %p369_p7 = pnand %p367_p6, %p364_p5 }
 0x246   :  { %372 = shalt.err (!%p369_p7)
}
 0x247   :  { %s378_s7 = smov 128   ;;  %s379_s8 = smov 8  }
 0x248   :  { %278 = dma.vmem_to_hbm [thread:$0]  %s273_s24, 512, %s482_s5, [#allocation3], %s378_s7, %s378_s7, %s379_s8  }
 0x249   :  { %373 = dma.done.wait [#allocation3], 512  }
 0x24a   :  { %374 = vsyncadd [#allocation3], 4294966784 }
 0x24b   :  { %282 = vsyncpa [#allocation3], 1 }

</bundles_post_ra>
